<compile_context>
chip_gen: v6e
topology: v6e:2x2x1
jax: 0.10.0
libtpu: 0.0.40
codegen_flags: <defaults>
</compile_context>

<pallas_src>
import functools

import jax
import jax.numpy as jnp
from jax.experimental import pallas as pl
from jax.experimental.pallas import tpu as pltpu


def _external_attention_kernel(q_ref, wk_ref, wv_ref, o_ref, *, mxu_dtype):
    # q_ref : (Bblk, N, D)   block of batch elements (D = true d_model, no padding)
    # wk_ref: (D, S)         pre-transposed mk weight (Wk.T), shared across steps
    # wv_ref: (S, D)         pre-transposed mv weight (Wv.T), shared across steps
    # o_ref : (Bblk, N, D)
    bblk, n, d = q_ref.shape
    s = wk_ref.shape[1]
    rows = bblk * n

    # ---- first matmul: flatten (Bblk, N) into the MXU M dimension -----------
    q2d = q_ref[...].reshape(rows, d).astype(mxu_dtype)
    logits = jnp.dot(q2d, wk_ref[...],
                     preferred_element_type=jnp.float32)        # (rows, S) f32

    # ---- softmax over the sequence axis N (PyTorch dim=1), f32, stable ------
    l3 = logits.reshape(bblk, n, s)
    m = jnp.max(l3, axis=1, keepdims=True)                      # (Bblk, 1, S)
    e = jnp.exp(l3 - m)                                         # (Bblk, N, S)
    denom_n = jnp.sum(e, axis=1, keepdims=True)                 # (Bblk, 1, S), >= 1
    p = e * pl.reciprocal(denom_n, approx=True)                 # EUP (free slot)

    # ---- renormalization over S (PyTorch dim=2); exact reciprocal ------------
    denom_s = jnp.sum(p, axis=2, keepdims=True)                 # (Bblk, N, 1)
    recip_s = pl.reciprocal(denom_s)                            # exact

    # ---- second matmul; fold the per-row 1/sum onto the cheaper side --------
    if s <= d:
        # scaling the (rows, S) probabilities touches fewer elements than (rows, D)
        p2d = (p * recip_s).astype(mxu_dtype).reshape(rows, s)
        out2d = jnp.dot(p2d, wv_ref[...],
                        preferred_element_type=jnp.float32)     # (rows, D)
        out = out2d.reshape(bblk, n, d)
    else:
        # row scaling commutes with the matmul -> apply to the smaller f32 output
        p2d = p.astype(mxu_dtype).reshape(rows, s)
        out2d = jnp.dot(p2d, wv_ref[...],
                        preferred_element_type=jnp.float32)     # (rows, D)
        out = out2d.reshape(bblk, n, d) * recip_s

    o_ref[...] = out.astype(o_ref.dtype)


def _pick_vmem_limit_bytes():
    """Per-generation scoped-VMEM limit (physical VMEM minus headroom)."""
    kind = ""
    try:
        kind = jax.devices()[0].device_kind.lower()
    except Exception:
        pass
    if "v2" in kind or "v3" in kind:
        return 12 * 1024 * 1024          # 16 MiB physical
    if "v4" in kind or "v5" in kind or "v6" in kind:
        return 96 * 1024 * 1024          # 128 MiB physical -> leave headroom
    return 48 * 1024 * 1024              # v7x has 64 MiB/TC; conservative default


def _choose_block_b(B, N, D, S, q_itemsize, out_itemsize, target_rows, vmem_budget):
    """Largest divisor of B whose (block_b, N, D) block fits the VMEM budget and
    ~target_rows MXU rows, preferring an even grid length (>=2) for v7x's 2 TCs."""

    def fits(bb):
        rows = bb * N
        io = 2 * rows * D * (q_itemsize + out_itemsize)   # double-buffered q + out tiles
        inter = 4 * rows * S * 4 + 2 * rows * D * 4       # f32 logits/exp/probs + out (+ casts)
        return io + inter <= vmem_budget

    divisors = [d for d in range(1, B + 1) if B % d == 0]
    feasible = [d for d in divisors if fits(d)]
    if not feasible:
        # Even a single batch element per step exceeds the budget; proceed with the
        # smallest block (may spill).  TODO(synk): online softmax over an N grid axis.
        feasible = [1]

    under = [d for d in feasible if d * N <= target_rows]
    best = max(under) if under else min(feasible)

    # Prefer an even number of grid steps (>=2) for megacore sharding, but only
    # from VMEM-feasible candidates and without shrinking the block below half.
    steps = B // best
    if steps % 2 != 0:                                    # covers steps == 1 too
        even = [d for d in feasible if (B // d) % 2 == 0]
        if even:
            cand = max(even)
            if steps == 1 or 2 * cand >= best:
                best = cand
    return best


def external_attention(queries, wk, wv, *, mxu_dtype=None, target_rows=2048):
    """queries: (B, N, D); wk: (S, D) = mk.weight; wv: (D, S) = mv.weight -> (B, N, D)."""
    B, N, D = queries.shape
    S = wk.shape[0]
    assert wk.shape == (S, D) and wv.shape == (D, S)
    out_dtype = queries.dtype

    # bf16 MXU inputs for f32 models (halves matmul passes; accumulation stays f32).
    if mxu_dtype is None:
        mxu_dtype = jnp.bfloat16 if queries.dtype == jnp.float32 else queries.dtype

    # One-time weight prep OUTSIDE the kernel (no per-step XLU transposes).
    # TODO(synk): hoist these out of the per-call path when weights are static.
    wk_t = wk.T.astype(mxu_dtype)     # (D, S): logits = q @ wk_t
    wv_t = wv.T.astype(mxu_dtype)     # (S, D): out    = p @ wv_t

    # ---- per-generation VMEM sizing -----------------------------------------
    vmem_limit = _pick_vmem_limit_bytes()
    weight_bytes = (wk_t.size + wv_t.size) * jnp.dtype(mxu_dtype).itemsize
    # Weights are double-buffered by the default pipeline (pipeline_mode=
    # pl.Buffered(1) would reclaim half; negligible at these sizes), and Mosaic
    # needs some internal scratch -> leave headroom.
    vmem_budget = max(vmem_limit - 2 * weight_bytes - 6 * 1024 * 1024,
                      4 * 1024 * 1024)

    block_b = _choose_block_b(
        B, N, D, S,
        q_itemsize=queries.dtype.itemsize,
        out_itemsize=jnp.dtype(out_dtype).itemsize,
        target_rows=target_rows,
        vmem_budget=vmem_budget,
    )
    grid = (B // block_b,)

    kernel = functools.partial(_external_attention_kernel, mxu_dtype=mxu_dtype)

    out = pl.pallas_call(
        kernel,
        out_shape=jax.ShapeDtypeStruct((B, N, D), out_dtype),
        grid_spec=pltpu.PrefetchScalarGridSpec(
            num_scalar_prefetch=0,
            grid=grid,
            in_specs=[
                # queries: blocked over batch; full N per block (dim=1 softmax needs it),
                # full D as the lane dim (== array dim, so no padding required).
                pl.BlockSpec((block_b, N, D), lambda b: (b, 0, 0)),
                # shared, constant-index weight tiles (fetched once, kept resident).
                pl.BlockSpec((D, S), lambda b: (0, 0)),              # Wk.T
                pl.BlockSpec((S, D), lambda b: (0, 0)),              # Wv.T
            ],
            out_specs=pl.BlockSpec((block_b, N, D), lambda b: (b, 0, 0)),
        ),
        compiler_params=pltpu.CompilerParams(
            dimension_semantics=("parallel",),
            vmem_limit_bytes=vmem_limit,
        ),
    )(queries, wk_t, wv_t)
    return out


def external_attention_ref(queries, wk, wv):
    """Pure-JAX f32 reference mirroring the PyTorch forward."""
    attn = jnp.einsum("bnd,sd->bns", queries, wk)
    attn = jax.nn.softmax(attn, axis=1)
    attn = attn / jnp.sum(attn, axis=2, keepdims=True)
    return jnp.einsum("bns,ds->bnd", attn, wv)


if __name__ == "__main__":
    # Small shapes consistent with the module: d_model=32, S=64, batch=2, seq=8.
    B, N, d_model, S = 2, 8, 32, 64

    key = jax.random.PRNGKey(0)
    kq, kk, kv = jax.random.split(key, 3)

    queries = jax.random.normal(kq, (B, N, d_model), dtype=jnp.float32)
    # nn.Linear init per the module's init_weights: normal(std=0.001), no bias.
    wk = 0.001 * jax.random.normal(kk, (S, d_model), dtype=jnp.float32)   # mk.weight
    wv = 0.001 * jax.random.normal(kv, (d_model, S), dtype=jnp.float32)   # mv.weight

    out = external_attention(queries, wk, wv)
    out = jax.block_until_ready(out)

    ref = external_attention_ref(queries, wk, wv)
    assert out.shape == (B, N, d_model)
    # bf16 MXU inputs + one approx (EUP) reciprocal -> ~0.5% worst-case drift.
    tol = 1e-2 * float(jnp.max(jnp.abs(ref))) + 1e-6
    max_err = float(jnp.max(jnp.abs(out.astype(jnp.float32) - ref)))
    assert max_err <= tol, f"mismatch vs reference: {max_err} > {tol}"

    print("KERNEL_OK")
</pallas_src>

<mosaic_0001>
module attributes {stable_mosaic.version = 11 : i64} {
  func.func @_external_attention_kernel(%arg0: i32, %arg1: memref<1x8x32xf32, #tpu.memory_space<vmem>>, %arg2: memref<32x64xbf16, #tpu.memory_space<vmem>>, %arg3: memref<64x32xbf16, #tpu.memory_space<vmem>>, %arg4: memref<1x8x32xf32, #tpu.memory_space<vmem>>) attributes {dimension_semantics = [#tpu.dimension_semantics<parallel>], iteration_bounds = array<i64: 2>, scalar_prefetch = 0 : i64, scratch_operands = 0 : i64, tpu.core_type = #tpu.core_type<tc>, window_params = [{transform_indices = @transform_0, window_bounds = array<i64: 1, 8, 32>}, {pipeline_mode = #tpu.pipeline_mode<synchronous>, transform_indices = @transform_1, window_bounds = array<i64: 32, 64>}, {pipeline_mode = #tpu.pipeline_mode<synchronous>, transform_indices = @transform_2, window_bounds = array<i64: 64, 32>}, {transform_indices = @transform_3, window_bounds = array<i64: 1, 8, 32>}]} {
    %c0 = arith.constant 0 : index
    %c0_0 = arith.constant 0 : index
    %c0_1 = arith.constant 0 : index
    %0 = vector.load %arg1[%c0, %c0_0, %c0_1] : memref<1x8x32xf32, #tpu.memory_space<vmem>>, vector<1x8x32xf32>
    %1 = vector.shape_cast %0 : vector<1x8x32xf32> to vector<8x32xf32>
    %2 = arith.truncf %1 : vector<8x32xf32> to vector<8x32xbf16>
    %c0_2 = arith.constant 0 : index
    %c0_3 = arith.constant 0 : index
    %3 = vector.load %arg2[%c0_2, %c0_3] : memref<32x64xbf16, #tpu.memory_space<vmem>>, vector<32x64xbf16>
    %cst = arith.constant dense<0.000000e+00> : vector<8x64xf32>
    %4 = tpu.matmul %2, %3, %cst {dimension_numbers = #tpu.dot_dimension_numbers<[1], [0], [0], [1], [0, 0, 1, 1], [], []>} : vector<8x32xbf16>, vector<32x64xbf16>, vector<8x64xf32> -> vector<8x64xf32>
    %5 = vector.shape_cast %4 : vector<8x64xf32> to vector<1x8x64xf32>
    %cst_4 = arith.constant dense<0xFF800000> : vector<1x64xf32>
    %6 = vector.multi_reduction <maximumf>, %5, %cst_4 [1] : vector<1x8x64xf32> to vector<1x64xf32>
    %7 = vector.shape_cast %6 : vector<1x64xf32> to vector<1x1x64xf32>
    %8 = vector.broadcast %7 : vector<1x1x64xf32> to vector<1x8x64xf32>
    %9 = arith.subf %5, %8 : vector<1x8x64xf32>
    %10 = math.exp %9 : vector<1x8x64xf32>
    %cst_5 = arith.constant dense<0.000000e+00> : vector<1x64xf32>
    %11 = vector.multi_reduction <add>, %10, %cst_5 [1] : vector<1x8x64xf32> to vector<1x64xf32>
    %12 = vector.shape_cast %11 : vector<1x64xf32> to vector<1x1x64xf32>
    %13 = tpu.reciprocal %12 {approx = true} : vector<1x1x64xf32> -> vector<1x1x64xf32>
    %14 = vector.broadcast %13 : vector<1x1x64xf32> to vector<1x8x64xf32>
    %15 = arith.mulf %10, %14 : vector<1x8x64xf32>
    %cst_6 = arith.constant dense<0.000000e+00> : vector<1x8xf32>
    %16 = vector.multi_reduction <add>, %15, %cst_6 [2] : vector<1x8x64xf32> to vector<1x8xf32>
    %17 = vector.shape_cast %16 : vector<1x8xf32> to vector<1x8x1xf32>
    %18 = tpu.reciprocal %17 : vector<1x8x1xf32> -> vector<1x8x1xf32>
    %19 = arith.truncf %15 : vector<1x8x64xf32> to vector<1x8x64xbf16>
    %20 = vector.shape_cast %19 : vector<1x8x64xbf16> to vector<8x64xbf16>
    %c0_7 = arith.constant 0 : index
    %c0_8 = arith.constant 0 : index
    %21 = vector.load %arg3[%c0_7, %c0_8] : memref<64x32xbf16, #tpu.memory_space<vmem>>, vector<64x32xbf16>
    %cst_9 = arith.constant dense<0.000000e+00> : vector<8x32xf32>
    %22 = tpu.matmul %20, %21, %cst_9 {dimension_numbers = #tpu.dot_dimension_numbers<[1], [0], [0], [1], [0, 0, 1, 1], [], []>} : vector<8x64xbf16>, vector<64x32xbf16>, vector<8x32xf32> -> vector<8x32xf32>
    %23 = vector.shape_cast %22 : vector<8x32xf32> to vector<1x8x32xf32>
    %24 = vector.broadcast %18 : vector<1x8x1xf32> to vector<1x8x32xf32>
    %25 = arith.mulf %23, %24 : vector<1x8x32xf32>
    %c0_10 = arith.constant 0 : index
    %c0_11 = arith.constant 0 : index
    %c0_12 = arith.constant 0 : index
    %26 = vector.load %arg4[%c0_10, %c0_11, %c0_12] : memref<1x8x32xf32, #tpu.memory_space<vmem>>, vector<1x8x32xf32>
    tpu.vector_store %arg4[%c0_10, %c0_11, %c0_12], %25 {strides = array<i32>} : memref<1x8x32xf32, #tpu.memory_space<vmem>>, vector<1x8x32xf32>,
    return
  }
  func.func @transform_0(%arg0: i32) -> (i32, i32, i32) {
    %c0_i32 = arith.constant 0 : i32
    %c0_i32_0 = arith.constant 0 : i32
    %c0_i32_1 = arith.constant 0 : i32
    return %arg0, %c0_i32, %c0_i32_0 : i32, i32, i32
  }
  func.func @transform_1(%arg0: i32) -> (i32, i32) {
    %c0_i32 = arith.constant 0 : i32
    %c0_i32_0 = arith.constant 0 : i32
    %c0_i32_1 = arith.constant 0 : i32
    return %c0_i32, %c0_i32_0 : i32, i32
  }
  func.func @transform_2(%arg0: i32) -> (i32, i32) {
    %c0_i32 = arith.constant 0 : i32
    %c0_i32_0 = arith.constant 0 : i32
    %c0_i32_1 = arith.constant 0 : i32
    return %c0_i32, %c0_i32_0 : i32, i32
  }
  func.func @transform_3(%arg0: i32) -> (i32, i32, i32) {
    %c0_i32 = arith.constant 0 : i32
    %c0_i32_0 = arith.constant 0 : i32
    %c0_i32_1 = arith.constant 0 : i32
    return %arg0, %c0_i32, %c0_i32_0 : i32, i32, i32
  }
}

</mosaic_0001>

<bundles_post_ra>
// kernel: tpu_custom_call.1
= control target key start
LH: loop header
LB: loop body
LE: loop exit
PB: predicated region body
PF: predicated region fallthrough
CT: control target
= control target key end

     0   :  { %8 = vsyncpa [#allocation3], 0  ;;  %s711_s0 = inlined_call_operand.vmem [shape: f32[2,8,32], index: 0, kind: input, shape index: {}]   ;;  %s712_s1 = inlined_call_operand.vmem [shape: bf16[32,64], index: 1, kind: input, shape index: {}]   ;;  %s713_s2 = inlined_call_operand.vmem [shape: bf16[64,32], index: 2, kind: input, shape index: {}]   ;;  %s714_s3 = inlined_call_operand.hbm [shape: f32[2,8,32], index: 3, kind: output, shape index: {}]  }
   0x1   :  { %10 = vsyncpa [#allocation3 + $0x1], 0  ;;  %s588_s12 = smov 0   ;;  %s590_s13 = smov 0  }
   0x2   :  { %s592_s14 = smov 0   ;;  %s594_s15 = smov 0  }
   0x3 LB: > { %s609_s16 = sadd.s32 4294967295, %s563_s15   ;;  %s404_s17 = sadd.s32 4294967294, %s563_s15   ;;  %s563_s15 = sphi %s594_s15, %s720_s15   ;;  %s559_s14 = sphi %s592_s14, %s719_s14   ;;  %s555_s13 = sphi %s590_s13, %s718_s13   ;;  %s551_s12 = sphi %s588_s12, %s717_s12  }
   0x4   : > { %s613_s18 = sadd.s32 1, %s563_s15   ;;  %s91_s19 = sadd.s32 1, %s559_s14 }
   0x5   : > { %s88_s20 = ssub.s32 %s563_s15, %s613_s18  ;;  %p101_p0 = scmp.ne.s32.totalorder %s559_s14, %s555_s13 }
   0x6   : > { %p89_p1 = scmp.eq.s32.totalorder %s88_s20, 0  ;;  %p102_p2 = scmp.eq.s32.totalorder %s609_s16, 1 }
   0x7   : > { %p107_p3 = scmp.ne.s32.totalorder %s555_s13, %s551_s12  ;;  %p108_p4 = scmp.eq.s32.totalorder %s404_s17, 1 }
   0x8   : > { %s624_s21 = scalar_select %p89_p1, %s559_s14, %s91_s19  }
   0x9   : > { %p626_p5 = por %p102_p2, %p101_p0  ;;  %p630_p6 = por %p108_p4, %p107_p3 }
   0xa   : > { %p407_p7 = scmp.ge.s32.totalorder %s563_s15, 1  ;;  %p139_p8 = scmp.lt.s32.totalorder %s563_s15, 3 }
   0xc   : > { %p140_p9 = pnand %p407_p7, %p139_p8 }
   0xd   : > { %p162_p10 = scmp.lt.s32.totalorder (!%p140_p9), %s609_s16, 1  ;;  %s159_s20 = sand.u32 (!%p140_p9), 1, %s555_s13  }
   0xe   : > { %143 = sbr.rel (%p140_p9) target bundleno = 492 (0x1ec), region = 32  ;;  %s408_s24 = sshll.u32 (!%p140_p9), %s159_s20, 3 }
   0xf   : > { %s419_s25 = sshll.u32 (!%p140_p9), %s609_s16, 7  ;;  %s161_s26 = scalar_lea.vmem (!%p140_p9), [#allocation2], %s408_s24 }
  0x10   : > { %s345_s27 = sshll.u32 (!%p140_p9), %s161_s26, 4  ;;  %s669_s30 = scalar_lea.hbm (!%p140_p9), %s714_s3, %s419_s25  ;;  %s671_s27 = int_to_ptr.vmem [resolvable:$true] %s345_s27 }
  0x11   : > { %s503_s4 = scalar_lea.vmem (!%p140_p9), %s671_s27, 128 }
  0x12   : > { %p504_p11 = scmp.ne.s32.totalorder (!%p140_p9), %s671_s27, %s503_s4 }
  0x13   : > { %v491_v0 = vld [vmem:[%s712_s1 + $0x8] sm:$0xff]   ;;  %v565_v1 = vmov 0.0   ;;  %v492_v2 = vld [vmem:[%s712_s1] sm:$0xff]   ;;  %vm566_vm0 = vmmov 0   ;;  %s163_s28 = scalar_select %p162_p10, %s609_s16, 1  ;;  %vm185_vm1 = vcmask 261120  }
  0x14   : > { %430 = vmatprep.subr.bf16.mxu0 %v565_v1  ;;  %438 = vmatprep.subr.bf16.mxu1 %v565_v1  ;;  %v493_v5 = vld [vmem:[%s713_s2 + $0x18] sm:$0xff]   ;;  %v494_v6 = vld [vmem:[%s713_s2 + $0x10] sm:$0xff]   ;;  %v495_v7 = vld [vmem:[%s713_s2 + $0x8] sm:$0xff]   ;;  %vm229_vm2 = vcmask 523264   ;;  %s332_s16 = scalar_lea.sflag [#allocation3], %s159_s20  ;;  %p505_p12 = pnand %p504_p11, %p626_p5 }
  0x15   : > { %431 = vmatpush3.bf16.msra.mxu0 %v491_v0  ;;  %434 = vmatprep.mubr.msk.bf16.mxu0 %vm566_vm0, %v565_v1  ;;  %s409_s29 = sshll.u32 %s163_s28, 3  ;;  %v496_v8 = vld [vmem:[%s713_s2] sm:$0xff]  }
  0x16   : > { %432 = vmatprep.subr.bf16.mxu0 %v565_v1  ;;  %446 = vmatprep.mubr.msk.bf16.mxu1 %vm566_vm0, %v565_v1  ;;  %s165_s5 = scalar_lea.vmem %s711_s0, %s409_s29  ;;  %p506_p13 = pneg %p505_p12 }
  0x17   : > { %v167_v3 = vld [vmem:[%s165_s5] sm:$0xff]  ;;  %439 = vmatpush3.bf16.msra.mxu1 %v493_v5  ;;  %s567_s5 = smov [#allocation2]  }
  0x18   : > { %v168_v4 = vpack.c.bf16 %v167_v3, %v167_v3  ;;  %440 = vmatprep.subr.bf16.mxu1 %v565_v1  ;;  %s507_s6 = sshll.u32 %s567_s5, 4  ;;  %s508_s6 = int_to_ptr.vmem [resolvable:$false] %s507_s6 }
  0x19   : > { %433 = vmatpush3.bf16.msra.mxu0 %v492_v2  ;;  %s509_s7 = scalar_lea.vmem %s508_s6, 256  ;;  %p510_p0 = scmp.lt.s32.totalorder %s671_s27, %s508_s6 }
  0x1a   : > { %p511_p1 = scmp.lt.s32.totalorder %s509_s7, %s503_s4 }
  0x1b   : > { %441 = vmatpush3.bf16.msra.mxu1 %v494_v6 }
  0x1c   : > { %435 = vmatmul.mubr.msk.bf16.vlgmr.msra.gmra.mxu0 %vm185_vm1, %v168_v4  ;;  %442 = vmatprep.subr.bf16.mxu1 %v565_v1  ;;  %p512_p2 = por %p511_p1, %p510_p0 }
  0x1e   : > { %p513_p3 = pnand %p512_p2, %p506_p13 }
  0x1f   : > { %443 = vmatpush3.bf16.msra.mxu1 %v495_v7 }
  0x20   : > { %444 = vmatprep.subr.bf16.mxu1 %v565_v1 }
  0x23   : > { %445 = vmatpush3.bf16.msra.mxu1 %v496_v8 }
  0xdc   : > { %v223_v9 = vpop.f32.mrf.mxu0 }
  0xdd   : > { %v230_v10 = vsel %vm229_vm2, %v223_v9, -inf }
  0xde   : > { %v231_v11 = vrot.slane %v230_v10, 4  ;;  %v436_v12 = vpop.f32.mrf.mxu0 }
  0xe0   : > { %v232_v13 = vmax.f32 %v230_v10, %v231_v11  ;;  %v226_v14 = vpop.f32.mrf.mxu0 }
  0xe2   : > { %v233_v15 = vrot.slane %v232_v13, 2  ;;  %v437_v16 = vpop.f32.mrf.mxu0 }
  0xe4   : > { %v234_v17 = vmax.f32 %v232_v13, %v233_v15 }
  0xe6   : > { %v235_v18 = vrot.slane %v234_v17, 1 }
  0xe8   : > { %v236_v19 = vmax.f32 %v234_v17, %v235_v18 }
  0xea   : > { %v237_v20 = vsub.f32 %v223_v9, %v236_v19 }
  0xec   : > { %v238_v21 = vmul.f32 1.442695, %v237_v20 }
  0xee   : > { %497 = vpow2.f32 %v238_v21 }
  0xfb   : > { %v498_v22 = vpop.eup %497 }
  0xfc   : > { %v240_v23 = vsel %vm229_vm2, %v498_v22, 0.0 }
  0xfd   : > { %v241_v24 = vrot.slane %v240_v23, 4 }
  0xff   : > { %v242_v25 = vadd.f32 %v241_v24, %v240_v23 }
 0x101   : > { %v243_v26 = vrot.slane %v242_v25, 2 }
 0x103   : > { %v244_v27 = vadd.f32 %v243_v26, %v242_v25 }
 0x105   : > { %v245_v28 = vrot.slane %v244_v27, 1 }
 0x107   : > { %v246_v29 = vadd.f32 %v245_v28, %v244_v27 }
 0x109   : > { %499 = vrcp.f32 %v246_v29 }
 0x116   : > { %v500_v30 = vpop.eup %499 }
 0x117   : > { %v248_v31 = vmul.f32 %v500_v30, %v498_v22 }
 0x119   : > { %v249_v32 = vsel %vm229_vm2, %v248_v31, 0.0  ;;  %v253_v33 = vpack.c.bf16 %v248_v31, %v248_v31 }
 0x11a   : > { %250 = vadd.xlane.f32.xlu0 %v249_v32 }
 0x11b   : > { %447 = vmatmul.mubr.msk.bf16.vlgmr.msra.gmra.mxu1 %vm229_vm2, %v253_v33 }
 0x1a3   : > { %v251_v34 = vpop.xlane.xlu0 %250 }
 0x1a4   : > { %501 = vrcp.f32 %v251_v34 }
 0x1b1   : > { %v502_v35 = vpop.eup %501 }
 0x1db   : > { %v323_v36 = vpop.f32.mrf.mxu1 }
 0x1dc   : > { %v329_v37 = vmul.f32 %v502_v35, %v323_v36 }
 0x1dd   : > { %v448_v38 = vpop.f32.mrf.mxu1 }
 0x1de   : > { %330 = vst.msk [vmem:[%s161_s26] sm:$0xff] %vm185_vm1, %v329_v37 }
 0x1df   : > { %v326_v39 = vpop.f32.mrf.mxu1 }
 0x1e0   : > { %516 = shalt.err (!%p513_p3)
}
 0x1e1   : > { %s517_s8 = scalar_lea.hbm %s669_s30, 128  ;;  %s521_s11 = scalar_lea.hbm %s714_s3, 256 }
 0x1e2   : > { %p518_p4 = scmp.ne.s32.totalorder %s669_s30, %s517_s8  ;;  %p522_p9 = scmp.lt.s32.totalorder %s669_s30, %s714_s3 }
 0x1e3   : > { %p523_p10 = scmp.lt.s32.totalorder %s521_s11, %s517_s8 }
 0x1e4   : > { %p519_p7 = pnand %p518_p4, %p626_p5 }
 0x1e5   : > { %p524_p11 = por %p523_p10, %p522_p9 }
 0x1e6   : > { %p520_p8 = pneg %p519_p7 }
 0x1e8   : > { %p525_p12 = pnand %p524_p11, %p520_p8 }
 0x1ea   : > { %528 = shalt.err (!%p525_p12)
}
 0x1eb   : > { %450 = dma.vmem_to_hbm [thread:$0]  (%p626_p5), %s671_s27, 128, %s669_s30, %s332_s16   ;;  %v449_v40 = vpop.f32.mrf.mxu1 }
 0x1ec PF: > { %p456_p13 = scmp.ge.s32.totalorder %s563_s15, 2  ;;  %s357_s20 = sand.u32 1, %s551_s12  }
 0x1ed   : > { %s358_s24 = scalar_lea.sflag [#allocation3], %s357_s20 }
 0x1ee   : > { %p453_p0 = pnand %p456_p13, %p630_p6 }
 0x1f0   : > { %p454_p1 = pneg %p453_p0 }
 0x1f2   : > { %546 = dma.done.wait (%p454_p1), %s358_s24, 128  }
 0x1f3   : > { %548 = vsyncadd (%p454_p1), %s358_s24, 4294967168  ;;  %p13_p2 = scmp.ge.s32.totalorder %s613_s18, 4   ;;  %s717_s12 = smov %s555_s13 }
 0x1f4   : > { %s718_s13 = smov %s559_s14  ;;  %s719_s14 = smov %s624_s21 }
 0x1f5   : > { %s720_s15 = smov %s613_s18  ;;  %15 = sbr.rel (!%p13_p2) target bundleno = 3 (0x3), region = 67 }
 0x1fa   :  { %363 = vsyncpa [#allocation3], 1 }
 0x1fb   :  { %365 = vsyncpa [#allocation3 + $0x1], 1 }

</bundles_post_ra>
